<compile_context>
chip_gen: v7x
topology: tpu7x:2x2x1
jax: 0.10.0
libtpu: 0.0.40
codegen_flags: <defaults>
</compile_context>

<pallas_src>
import jax
import jax.numpy as jnp
from jax.experimental import pallas as pl
from jax.experimental.pallas import tpu as pltpu

_IN_FEATURES = 784
_HIDDEN = 512


def _disc_kernel(x_ref, w1_ref, b1_ref, w2_ref, b2_ref, o_ref):
    # Fused f32 -> bf16 cast of the x tile (cheap VPU op, hidden under the MXU).
    x_bf = x_ref[...].astype(jnp.bfloat16)
    # fc1: (TB, 784)bf16 @ (784, 512)bf16 -> f32 accumulation on the MXU.
    h = jnp.dot(x_bf, w1_ref[...], preferred_element_type=jnp.float32)
    h = h + b1_ref[...]                       # (1, 512) f32 bias, broadcast
    # LeakyReLU(0.1) in f32 on the VPU.
    h = jnp.where(h > 0, h, 0.1 * h)
    # fc2 as VPU multiply + lane reduction (avoids an N=1 MXU matmul).
    y = jnp.sum(h * w2_ref[...], axis=-1, keepdims=True) + b2_ref[0, 0]
    # Sigmoid: exp + approximate reciprocal both go to the EUP slot.
    o_ref[...] = pl.reciprocal(1.0 + jnp.exp(-y), approx=True).astype(o_ref.dtype)


def _pick_batch_tile(B, tb):
    """Batch tile: multiple of 8 sublanes (or == B for tiny batches), never
    larger than B; for B >= 1024, capped at ceil(B/2) so the grid has at least
    two "parallel" steps (megacore sharding on v7x)."""
    if B < 8:
        return B                              # block == full batch dim (legal)
    TB = min(tb, (B // 8) * 8)                # largest multiple of 8 <= B
    if B >= 1024:
        TB = min(TB, ((pl.cdiv(B, 2) + 7) // 8) * 8)
    return TB


def discriminator_forward(x, w1, b1, w2, b2, *, tb=2048):
    """x: any shape whose trailing dims flatten to 784 (e.g. NCHW (B,1,28,28)).

    w1: (784, 512), b1: (512,), w2: (512, 1), b2: (1,). Returns (B, 1) f32.
    fc1 runs in bf16 on the MXU (f32 accumulation); everything else is f32.
    """
    x2 = x.reshape(-1, _IN_FEATURES)
    if x2.dtype != jnp.float32:
        x2 = x2.astype(jnp.float32)
    B = x2.shape[0]

    TB = _pick_batch_tile(B, tb)
    grid = (pl.cdiv(B, TB),)

    # Weights are tiny (<1.6 MB): wrapper-side casts/reshapes cost nothing next
    # to the per-step x DMA, and the blocks stay VMEM-resident via constant
    # index_maps (no re-DMA across grid steps).
    w1_bf = w1.astype(jnp.bfloat16)
    b1_r = b1.reshape(1, _HIDDEN).astype(jnp.float32)
    w2_r = w2.reshape(1, _HIDDEN).astype(jnp.float32)   # (512,1) -> row for VPU fc2
    b2_r = b2.reshape(1, 1).astype(jnp.float32)

    return pl.pallas_call(
        _disc_kernel,
        out_shape=jax.ShapeDtypeStruct((B, 1), jnp.float32),
        grid=grid,
        in_specs=[
            # x: batch-tiled, double-buffered by the auto-pipeline.
            # (pl.Buffered(3) would buy a few % more DMA overlap on v6e.)
            pl.BlockSpec((TB, _IN_FEATURES), lambda i: (i, 0)),
            pl.BlockSpec((_IN_FEATURES, _HIDDEN), lambda i: (0, 0)),  # w1 resident
            pl.BlockSpec((1, _HIDDEN), lambda i: (0, 0)),             # b1 resident
            pl.BlockSpec((1, _HIDDEN), lambda i: (0, 0)),             # w2 row resident
            pl.BlockSpec(memory_space=pltpu.MemorySpace.SMEM),        # b2 scalar
        ],
        out_specs=pl.BlockSpec((TB, 1), lambda i: (i, 0)),
        compiler_params=pltpu.CompilerParams(
            dimension_semantics=("parallel",),
            # TB=2048 f32 x tiles need ~14.5 MB (2 buffers + resident weights);
            # request 32 MiB explicitly so v5e's 16 MiB scoped default can't bite
            # while staying well inside v7x's 64 MiB physical VMEM.
            vmem_limit_bytes=32 * 1024 * 1024,
        ),
    )(x2, w1_bf, b1_r, w2_r, b2_r)


def init_params(key):
    # Deterministic init mimicking PyTorch nn.Linear default U(-1/sqrt(in), 1/sqrt(in)).
    k1, k2, k3, k4 = jax.random.split(key, 4)
    lim1 = 1.0 / jnp.sqrt(784.0)
    lim2 = 1.0 / jnp.sqrt(512.0)
    w1 = jax.random.uniform(k1, (784, 512), jnp.float32, -lim1, lim1)  # (in, out)
    b1 = jax.random.uniform(k2, (512,), jnp.float32, -lim1, lim1)
    w2 = jax.random.uniform(k3, (512, 1), jnp.float32, -lim2, lim2)    # (in, out)
    b2 = jax.random.uniform(k4, (1,), jnp.float32, -lim2, lim2)
    return w1, b1, w2, b2


if __name__ == "__main__":
    key = jax.random.PRNGKey(0)
    kx, kp = jax.random.split(key)

    # Small MNIST-like batch: (B, C, H, W) = (4, 1, 28, 28) -> flattens to (4, 784).
    x = jax.random.normal(kx, (4, 1, 28, 28), jnp.float32)
    w1, b1, w2, b2 = init_params(kp)

    out = discriminator_forward(x, w1, b1, w2, b2)
    out = jax.block_until_ready(out)

    # Reference matching the kernel's bf16 fc1 / f32-everything-else recipe.
    xr = x.reshape(-1, 784)
    h = jnp.dot(xr.astype(jnp.bfloat16), w1.astype(jnp.bfloat16),
                preferred_element_type=jnp.float32) + b1
    h = jnp.where(h > 0, h, 0.1 * h)
    ref = jax.nn.sigmoid(h @ w2 + b2)

    assert out.shape == (4, 1)
    assert jnp.allclose(out, ref, atol=5e-3, rtol=5e-3)

    print("KERNEL_OK")
</pallas_src>

<mosaic_0001>
module attributes {stable_mosaic.version = 11 : i64} {
  func.func @_disc_kernel(%arg0: i32, %arg1: memref<4x784xf32, #tpu.memory_space<vmem>>, %arg2: memref<784x512xbf16, #tpu.memory_space<vmem>>, %arg3: memref<1x512xf32, #tpu.memory_space<vmem>>, %arg4: memref<1x512xf32, #tpu.memory_space<vmem>>, %arg5: memref<1x1xf32, #tpu.memory_space<smem>>, %arg6: memref<4x1xf32, #tpu.memory_space<vmem>>) attributes {dimension_semantics = [#tpu.dimension_semantics<parallel>], iteration_bounds = array<i64: 1>, scalar_prefetch = 0 : i64, scratch_operands = 0 : i64, tpu.core_type = #tpu.core_type<tc>, window_params = [{transform_indices = @transform_0, window_bounds = array<i64: 4, 784>}, {pipeline_mode = #tpu.pipeline_mode<synchronous>, transform_indices = @transform_1, window_bounds = array<i64: 784, 512>}, {pipeline_mode = #tpu.pipeline_mode<synchronous>, transform_indices = @transform_2, window_bounds = array<i64: 1, 512>}, {pipeline_mode = #tpu.pipeline_mode<synchronous>, transform_indices = @transform_3, window_bounds = array<i64: 1, 512>}, {transform_indices = @transform_4, window_bounds = array<i64: 1, 1>}, {transform_indices = @transform_5, window_bounds = array<i64: 4, 1>}]} {
    %c0 = arith.constant 0 : index
    %c0_0 = arith.constant 0 : index
    %0 = vector.load %arg1[%c0, %c0_0] : memref<4x784xf32, #tpu.memory_space<vmem>>, vector<4x784xf32>
    %1 = arith.truncf %0 : vector<4x784xf32> to vector<4x784xbf16>
    %c0_1 = arith.constant 0 : index
    %c0_2 = arith.constant 0 : index
    %2 = vector.load %arg2[%c0_1, %c0_2] : memref<784x512xbf16, #tpu.memory_space<vmem>>, vector<784x512xbf16>
    %cst = arith.constant dense<0.000000e+00> : vector<4x512xf32>
    %3 = tpu.matmul %1, %2, %cst {dimension_numbers = #tpu.dot_dimension_numbers<[1], [0], [0], [1], [0, 0, 1, 1], [], []>} : vector<4x784xbf16>, vector<784x512xbf16>, vector<4x512xf32> -> vector<4x512xf32>
    %c0_3 = arith.constant 0 : index
    %c0_4 = arith.constant 0 : index
    %4 = vector.load %arg3[%c0_3, %c0_4] : memref<1x512xf32, #tpu.memory_space<vmem>>, vector<1x512xf32>
    %5 = vector.broadcast %4 : vector<1x512xf32> to vector<4x512xf32>
    %6 = arith.addf %3, %5 : vector<4x512xf32>
    %cst_5 = arith.constant 0.000000e+00 : f32
    %7 = vector.broadcast %cst_5 : f32 to vector<4x512xf32>
    %8 = arith.cmpf ogt, %6, %7 : vector<4x512xf32>
    %cst_6 = arith.constant 1.000000e-01 : f32
    %9 = vector.broadcast %cst_6 : f32 to vector<4x512xf32>
    %10 = arith.mulf %9, %6 : vector<4x512xf32>
    %11 = arith.select %8, %6, %10 : vector<4x512xi1>, vector<4x512xf32>
    %c0_7 = arith.constant 0 : index
    %c0_8 = arith.constant 0 : index
    %12 = vector.load %arg4[%c0_7, %c0_8] : memref<1x512xf32, #tpu.memory_space<vmem>>, vector<1x512xf32>
    %13 = vector.broadcast %12 : vector<1x512xf32> to vector<4x512xf32>
    %14 = arith.mulf %11, %13 : vector<4x512xf32>
    %cst_9 = arith.constant dense<0.000000e+00> : vector<4xf32>
    %15 = vector.multi_reduction <add>, %14, %cst_9 [1] : vector<4x512xf32> to vector<4xf32>
    %16 = vector.shape_cast %15 : vector<4xf32> to vector<4x1xf32>
    %c0_10 = arith.constant 0 : index
    %c0_11 = arith.constant 0 : index
    %17 = memref.load %arg5[%c0_10, %c0_11] : memref<1x1xf32, #tpu.memory_space<smem>>
    %18 = vector.broadcast %17 : f32 to vector<4x1xf32>
    %19 = arith.addf %16, %18 : vector<4x1xf32>
    %cst_12 = arith.constant 0.000000e+00 : f32
    %20 = vector.broadcast %cst_12 : f32 to vector<4x1xf32>
    %21 = arith.subf %20, %19 : vector<4x1xf32>
    %22 = math.exp %21 : vector<4x1xf32>
    %cst_13 = arith.constant 1.000000e+00 : f32
    %23 = vector.broadcast %cst_13 : f32 to vector<4x1xf32>
    %24 = arith.addf %23, %22 : vector<4x1xf32>
    %25 = tpu.reciprocal %24 {approx = true} : vector<4x1xf32> -> vector<4x1xf32>
    %c0_14 = arith.constant 0 : index
    %c0_15 = arith.constant 0 : index
    %26 = vector.load %arg6[%c0_14, %c0_15] : memref<4x1xf32, #tpu.memory_space<vmem>>, vector<4x1xf32>
    tpu.vector_store %arg6[%c0_14, %c0_15], %25 {strides = array<i32>} : memref<4x1xf32, #tpu.memory_space<vmem>>, vector<4x1xf32>,
    return
  }
  func.func @transform_0(%arg0: i32) -> (i32, i32) {
    %c0_i32 = arith.constant 0 : i32
    %c0_i32_0 = arith.constant 0 : i32
    return %arg0, %c0_i32 : i32, i32
  }
  func.func @transform_1(%arg0: i32) -> (i32, i32) {
    %c0_i32 = arith.constant 0 : i32
    %c0_i32_0 = arith.constant 0 : i32
    %c0_i32_1 = arith.constant 0 : i32
    return %c0_i32, %c0_i32_0 : i32, i32
  }
  func.func @transform_2(%arg0: i32) -> (i32, i32) {
    %c0_i32 = arith.constant 0 : i32
    %c0_i32_0 = arith.constant 0 : i32
    %c0_i32_1 = arith.constant 0 : i32
    return %c0_i32, %c0_i32_0 : i32, i32
  }
  func.func @transform_3(%arg0: i32) -> (i32, i32) {
    %c0_i32 = arith.constant 0 : i32
    %c0_i32_0 = arith.constant 0 : i32
    %c0_i32_1 = arith.constant 0 : i32
    return %c0_i32, %c0_i32_0 : i32, i32
  }
  func.func @transform_4(%arg0: i32) -> (i32, i32) {
    %c0_i32 = arith.constant 0 : i32
    %c0_i32_0 = arith.constant 0 : i32
    %c0_i32_1 = arith.constant 0 : i32
    return %c0_i32, %c0_i32_0 : i32, i32
  }
  func.func @transform_5(%arg0: i32) -> (i32, i32) {
    %c0_i32 = arith.constant 0 : i32
    %c0_i32_0 = arith.constant 0 : i32
    return %arg0, %c0_i32 : i32, i32
  }
}

</mosaic_0001>

<bundles_post_ra>
// kernel: tpu_custom_call.1
= control target key start
LH: loop header
LB: loop body
LE: loop exit
PB: predicated region body
PF: predicated region fallthrough
CT: control target
= control target key end

     0   :  { %11 = vsyncpa [#allocation4], 0  ;;  %s2332_s0 = inlined_call_operand.hbm [shape: f32[4,784], index: 0, kind: input, shape index: {}]   ;;  %s2333_s1 = inlined_call_operand.hbm [shape: bf16[784,512], index: 1, kind: input, shape index: {}]   ;;  %s2334_s2 = inlined_call_operand.vmem [shape: f32[1,512], index: 2, kind: input, shape index: {}]   ;;  %s2335_s3 = inlined_call_operand.vmem [shape: f32[1,512], index: 3, kind: input, shape index: {}]   ;;  %s2336_s4 = inlined_call_operand.<no memory space> [shape: f32[1,1], index: 4, kind: input, shape index: {}]   ;;  %s2337_s5 = inlined_call_operand.vmem [shape: f32[4,1], index: 5, kind: output, shape index: {}]  }
   0x1   :  { %12 = vsyncpa [#allocation6], 0  ;;  %s2242_s18 = smov [#allocation3]   ;;  %s2243_s20 = smov [#allocation5]  }
   0x2   :  { %s19_s19 = sshll.u32 %s2242_s18, 4  ;;  %s28_s21 = sshll.u32 %s2243_s20, 4  ;;  %s20_s19 = int_to_ptr.vmem [resolvable:$true] %s19_s19  ;;  %s2277_s21 = int_to_ptr.vmem [resolvable:$true] %s28_s21 }
   0x3   :  { %s2194_s24 = scalar_lea.hbm %s2332_s0, 448 }
   0x4   :  { %p2195_p0 = scmp.ne.s32.totalorder %s2332_s0, %s2194_s24  ;;  %p2198_p1 = scmp.lt.u32.totalorder %s2194_s24, %s2332_s0 }
   0x6   :  { %p2200_p2 = pnand %p2198_p1, %p2195_p0 }
   0x8   :  { %2203 = shalt.err (!%p2200_p2)
}
   0x9   :  { %s2204_s29 = scalar_lea.vmem %s20_s19, 448  ;;  %p2209_p4 = scmp.lt.s32.totalorder %s20_s19, %s20_s19 }
   0xa   :  { %p2205_p3 = scmp.ne.s32.totalorder %s20_s19, %s2204_s29  ;;  %p2210_p5 = scmp.lt.s32.totalorder %s2204_s29, %s2204_s29 }
   0xc   :  { %p2211_p6 = por %p2210_p5, %p2209_p4 }
   0xe   :  { %p2212_p7 = pnand %p2211_p6, %p2205_p3 }
  0x10   :  { %2215 = shalt.err (!%p2212_p7)
}
  0x11   :  { %22 = dma.hbm_to_vmem [thread:$0]  %s2332_s0, 448, %s20_s19, [#allocation4]  }
  0x12   :  { %s2216_s9 = scalar_lea.hbm %s2333_s1, 25088 }
  0x13   :  { %p2217_p8 = scmp.ne.s32.totalorder %s2333_s1, %s2216_s9  ;;  %p2220_p9 = scmp.lt.u32.totalorder %s2216_s9, %s2333_s1 }
  0x15   :  { %p2222_p10 = pnand %p2220_p9, %p2217_p8 }
  0x17   :  { %2225 = shalt.err (!%p2222_p10)
}
  0x18   :  { %s2226_s14 = scalar_lea.vmem %s2277_s21, 25088  ;;  %p2231_p12 = scmp.lt.s32.totalorder %s2277_s21, %s2277_s21 }
  0x19   :  { %p2227_p11 = scmp.ne.s32.totalorder %s2277_s21, %s2226_s14  ;;  %p2232_p13 = scmp.lt.s32.totalorder %s2226_s14, %s2226_s14 }
  0x1b   :  { %p2233_p0 = por %p2232_p13, %p2231_p12 }
  0x1d   :  { %p2234_p1 = pnand %p2233_p0, %p2227_p11 }
  0x1f   :  { %2237 = shalt.err (!%p2234_p1)
}
  0x20   :  { %s2244_s0 = smov 256   ;;  %s2245_s15 = smov 16  }
  0x21   :  { %34 = dma.hbm_to_vmem [thread:$0]  %s2333_s1, 25088, %s2277_s21, [#allocation6], %s2244_s0, %s2244_s0, %s2245_s15  }
  0x22   :  { %2238 = dma.done.wait [#allocation4], 448  }
  0x23   :  { %2239 = vsyncadd [#allocation4], 4294966848 }
  0x24   :  { %2240 = dma.done.wait [#allocation6], 25088  }
  0x25   :  { %2241 = vsyncadd [#allocation6], 4294942208  ;;  %v1893_v0 = vld [vmem:[#allocation5 + $0x4] ss:$16 sps:$4 sm:$0xff]   ;;  %v1895_v1 = vld [vmem:[#allocation5 + $0xc] ss:$16 sps:$4 sm:$0xff]  }
  0x26   :  { %1270 = vmatprep.subr.bf16.mxu0 %v1893_v0  ;;  %v1897_v2 = vld [vmem:[#allocation5] ss:$16 sps:$4 sm:$0xff]   ;;  %v1898_v3 = vld [vmem:[#allocation5 + $0x8] ss:$16 sps:$4 sm:$0xff]   ;;  %1434 = vmatprep.subr.bf16.mxu1 %v1895_v1  ;;  %v1899_v4 = vld [vmem:[#allocation5 + $0x24] ss:$16 sps:$4 sm:$0xff]  }
  0x27   :  { %1271 = vmatpush1.bf16.msra.mxu0 %v1897_v2  ;;  %1435 = vmatpush1.bf16.msra.mxu1 %v1898_v3  ;;  %v1901_v5 = vld [vmem:[#allocation5 + $0x2c] ss:$16 sps:$4 sm:$0xff]   ;;  %v1903_v6 = vld [vmem:[#allocation5 + $0x20] ss:$16 sps:$4 sm:$0xff]   ;;  %v1904_v7 = vld [vmem:[#allocation5 + $0x28] ss:$16 sps:$4 sm:$0xff]  }
  0x28   :  { %1272 = vmatprep.subr.bf16.mxu0 %v1899_v4  ;;  %1436 = vmatprep.subr.bf16.mxu1 %v1901_v5  ;;  %v1905_v8 = vld [vmem:[#allocation5 + $0x44] ss:$16 sps:$4 sm:$0xff]   ;;  %v1907_v9 = vld [vmem:[#allocation5 + $0x4c] ss:$16 sps:$4 sm:$0xff]   ;;  %v1909_v10 = vld [vmem:[#allocation5 + $0x40] ss:$16 sps:$4 sm:$0xff]  }
  0x29   :  { %v1910_v11 = vld [vmem:[#allocation5 + $0x48] ss:$16 sps:$4 sm:$0xff]   ;;  %v1911_v12 = vld [vmem:[#allocation5 + $0x64] ss:$16 sps:$4 sm:$0xff]   ;;  %v1913_v13 = vld [vmem:[#allocation5 + $0x6c] ss:$16 sps:$4 sm:$0xff]  }
  0x2a   :  { %v1915_v14 = vld [vmem:[#allocation5 + $0x60] ss:$16 sps:$4 sm:$0xff]   ;;  %v1916_v15 = vld [vmem:[#allocation5 + $0x68] ss:$16 sps:$4 sm:$0xff]   ;;  %v1917_v16 = vld [vmem:[#allocation5 + $0x84] ss:$16 sps:$4 sm:$0xff]  }
  0x2b   :  { %1273 = vmatpush1.bf16.msra.mxu0 %v1903_v6  ;;  %1437 = vmatpush1.bf16.msra.mxu1 %v1904_v7  ;;  %v1919_v17 = vld [vmem:[#allocation5 + $0x8c] ss:$16 sps:$4 sm:$0xff]   ;;  %v1921_v18 = vld [vmem:[#allocation5 + $0x80] ss:$16 sps:$4 sm:$0xff]   ;;  %v1922_v19 = vld [vmem:[#allocation5 + $0x88] ss:$16 sps:$4 sm:$0xff]  }
  0x2c   :  { %1274 = vmatprep.subr.bf16.mxu0 %v1905_v8  ;;  %1438 = vmatprep.subr.bf16.mxu1 %v1907_v9  ;;  %v1923_v20 = vld [vmem:[#allocation5 + $0xa4] ss:$16 sps:$4 sm:$0xff]   ;;  %v1925_v21 = vld [vmem:[#allocation5 + $0xac] ss:$16 sps:$4 sm:$0xff]   ;;  %v1927_v22 = vld [vmem:[#allocation5 + $0xa0] ss:$16 sps:$4 sm:$0xff]  }
  0x2d   :  { %v1928_v23 = vld [vmem:[#allocation5 + $0xa8] ss:$16 sps:$4 sm:$0xff]   ;;  %v1929_v24 = vld [vmem:[#allocation5 + $0xc4] ss:$16 sps:$4 sm:$0xff]   ;;  %v1931_v25 = vld [vmem:[#allocation5 + $0xcc] ss:$16 sps:$4 sm:$0xff]  }
  0x2e   :  { %v1933_v26 = vld [vmem:[#allocation5 + $0xc0] ss:$16 sps:$4 sm:$0xff]   ;;  %v1934_v27 = vld [vmem:[#allocation5 + $0xc8] ss:$16 sps:$4 sm:$0xff]   ;;  %v1935_v28 = vld [vmem:[#allocation5 + $0xe4] ss:$16 sps:$4 sm:$0xff]  }
  0x2f   :  { %1275 = vmatpush1.bf16.msra.mxu0 %v1909_v10  ;;  %1439 = vmatpush1.bf16.msra.mxu1 %v1910_v11  ;;  %v1937_v29 = vld [vmem:[#allocation5 + $0xec] ss:$16 sps:$4 sm:$0xff]   ;;  %v1939_v30 = vld [vmem:[#allocation5 + $0xe0] ss:$16 sps:$4 sm:$0xff]   ;;  %v1940_v31 = vld [vmem:[#allocation5 + $0xe8] ss:$16 sps:$4 sm:$0xff]  }
  0x30   :  { %1276 = vmatprep.subr.bf16.mxu0 %v1911_v12  ;;  %1440 = vmatprep.subr.bf16.mxu1 %v1913_v13  ;;  %v1941_v32 = vld [vmem:[#allocation5 + $0x104] ss:$16 sps:$4 sm:$0xff]   ;;  %v1943_v33 = vld [vmem:[#allocation5 + $0x10c] ss:$16 sps:$4 sm:$0xff]   ;;  %v1945_v34 = vld [vmem:[#allocation5 + $0x100] ss:$16 sps:$4 sm:$0xff]  }
  0x31   :  { %v1946_v35 = vld [vmem:[#allocation5 + $0x108] ss:$16 sps:$4 sm:$0xff]   ;;  %v1947_v36 = vld [vmem:[#allocation5 + $0x124] ss:$16 sps:$4 sm:$0xff]   ;;  %v1949_v37 = vld [vmem:[#allocation5 + $0x12c] ss:$16 sps:$4 sm:$0xff]  }
  0x32   :  { %v1951_v38 = vld [vmem:[#allocation5 + $0x120] ss:$16 sps:$4 sm:$0xff]   ;;  %v1952_v39 = vld [vmem:[#allocation5 + $0x128] ss:$16 sps:$4 sm:$0xff]   ;;  %v1953_v40 = vld [vmem:[#allocation5 + $0x144] ss:$16 sps:$4 sm:$0xff]  }
  0x33   :  { %1277 = vmatpush1.bf16.msra.mxu0 %v1915_v14  ;;  %1441 = vmatpush1.bf16.msra.mxu1 %v1916_v15  ;;  %v1955_v41 = vld [vmem:[#allocation5 + $0x14c] ss:$16 sps:$4 sm:$0xff]   ;;  %v1957_v42 = vld [vmem:[#allocation5 + $0x140] ss:$16 sps:$4 sm:$0xff]   ;;  %v1958_v43 = vld [vmem:[#allocation5 + $0x148] ss:$16 sps:$4 sm:$0xff]  }
  0x34   :  { %1278 = vmatprep.subr.bf16.mxu0 %v1917_v16  ;;  %1442 = vmatprep.subr.bf16.mxu1 %v1919_v17  ;;  %v1959_v44 = vld [vmem:[#allocation5 + $0x164] ss:$16 sps:$4 sm:$0xff]   ;;  %v1961_v45 = vld [vmem:[#allocation5 + $0x16c] ss:$16 sps:$4 sm:$0xff]   ;;  %v1963_v47 = vld [vmem:[#allocation5 + $0x160] ss:$16 sps:$4 sm:$0xff]  }
  0x35   :  { %v48_v46 = vld [vmem:[#allocation3] sm:$0xff]  ;;  %v1967_v51 = vld [vmem:[#allocation5 + $0x18c] ss:$16 sps:$4 sm:$0xff]   ;;  %v1969_v53 = vld [vmem:[#allocation5 + $0x180] ss:$16 sps:$4 sm:$0xff]   ;;  %vm1266_vm0 = vcmask 130048  }
  0x36   :  { %v55_v48 = vcombine.high %v48_v46, %v48_v46  ;;  %v1964_v49 = vld [vmem:[#allocation5 + $0x168] ss:$16 sps:$4 sm:$0xff]   ;;  %v1965_v50 = vld [vmem:[#allocation5 + $0x184] ss:$16 sps:$4 sm:$0xff]   ;;  %v1973_v56 = vld [vmem:[#allocation5 + $0x1ac] ss:$16 sps:$4 sm:$0xff]   ;;  %v61_v6 = vpack.c.bf16 %v48_v46, %v48_v46 }
  0x37   :  { %1279 = vmatpush1.bf16.msra.mxu0 %v1921_v18  ;;  %1443 = vmatpush1.bf16.msra.mxu1 %v1922_v19  ;;  %v1970_v54 = vld [vmem:[#allocation5 + $0x188] ss:$16 sps:$4 sm:$0xff]   ;;  %v1971_v55 = vld [vmem:[#allocation5 + $0x1a4] ss:$16 sps:$4 sm:$0xff]   ;;  %v1975_v57 = vld [vmem:[#allocation5 + $0x1a0] ss:$16 sps:$4 sm:$0xff]  }
  0x38   :  { %1280 = vmatprep.subr.bf16.mxu0 %v1923_v20  ;;  %1444 = vmatprep.subr.bf16.mxu1 %v1925_v21  ;;  %v62_v52 = vpack.c.bf16 %v55_v48, %v55_v48  ;;  %v1976_v58 = vld [vmem:[#allocation5 + $0x1a8] ss:$16 sps:$4 sm:$0xff]   ;;  %v1977_v59 = vld [vmem:[#allocation5 + $0x1c4] ss:$16 sps:$4 sm:$0xff]   ;;  %v1979_v60 = vld [vmem:[#allocation5 + $0x1cc] ss:$16 sps:$4 sm:$0xff]  }
  0x39   :  { %v1981_v61 = vld [vmem:[#allocation5 + $0x1c0] ss:$16 sps:$4 sm:$0xff]   ;;  %v1982_v62 = vld [vmem:[#allocation5 + $0x1c8] ss:$16 sps:$4 sm:$0xff]   ;;  %v1983_v63 = vld [vmem:[#allocation5 + $0x1e4] ss:$16 sps:$4 sm:$0xff]  }
  0x3a   :  { %1302 = vmatprep.mubr.bf16.mxu0 %v62_v52  ;;  %1466 = vmatprep.mubr.bf16.mxu1 %v62_v52  ;;  %v1985_v0 = vld [vmem:[#allocation5 + $0x1ec] ss:$16 sps:$4 sm:$0xff]   ;;  %v1987_v1 = vld [vmem:[#allocation5 + $0x1e0] ss:$16 sps:$4 sm:$0xff]   ;;  %v1988_v2 = vld [vmem:[#allocation5 + $0x1e8] ss:$16 sps:$4 sm:$0xff]  }
  0x3b   :  { %1281 = vmatpush1.bf16.msra.mxu0 %v1927_v22  ;;  %1445 = vmatpush1.bf16.msra.mxu1 %v1928_v23  ;;  %v1992_v3 = vld [vmem:[#allocation5 + $0x204] ss:$16 sps:$4 sm:$0xff]   ;;  %v1995_v4 = vld [vmem:[#allocation5 + $0x20c] ss:$16 sps:$4 sm:$0xff]   ;;  %v1990_v5 = vld [vmem:[#allocation5 + $0x200] ss:$16 sps:$4 sm:$0xff]  }
  0x3c   :  { %1282 = vmatprep.subr.bf16.mxu0 %v1929_v24  ;;  %1446 = vmatprep.subr.bf16.mxu1 %v1931_v25  ;;  %v1993_v7 = vld [vmem:[#allocation5 + $0x208] ss:$16 sps:$4 sm:$0xff]   ;;  %v1998_v8 = vld [vmem:[#allocation5 + $0x224] ss:$16 sps:$4 sm:$0xff]   ;;  %v2001_v9 = vld [vmem:[#allocation5 + $0x22c] ss:$16 sps:$4 sm:$0xff]  }
  0x3d   :  { %v1996_v10 = vld [vmem:[#allocation5 + $0x220] ss:$16 sps:$4 sm:$0xff]   ;;  %v1999_v11 = vld [vmem:[#allocation5 + $0x228] ss:$16 sps:$4 sm:$0xff]   ;;  %v2004_v12 = vld [vmem:[#allocation5 + $0x244] ss:$16 sps:$4 sm:$0xff]  }
  0x3e   :  { %v2007_v13 = vld [vmem:[#allocation5 + $0x24c] ss:$16 sps:$4 sm:$0xff]   ;;  %v2002_v14 = vld [vmem:[#allocation5 + $0x240] ss:$16 sps:$4 sm:$0xff]   ;;  %v2005_v15 = vld [vmem:[#allocation5 + $0x248] ss:$16 sps:$4 sm:$0xff]  }
  0x3f   :  { %1283 = vmatpush1.bf16.msra.mxu0 %v1933_v26  ;;  %1447 = vmatpush1.bf16.msra.mxu1 %v1934_v27  ;;  %v2010_v16 = vld [vmem:[#allocation5 + $0x264] ss:$16 sps:$4 sm:$0xff]   ;;  %v2013_v17 = vld [vmem:[#allocation5 + $0x26c] ss:$16 sps:$4 sm:$0xff]   ;;  %v2008_v18 = vld [vmem:[#allocation5 + $0x260] ss:$16 sps:$4 sm:$0xff]  }
  0x40   :  { %1284 = vmatprep.subr.bf16.mxu0 %v1935_v28  ;;  %1448 = vmatprep.subr.bf16.mxu1 %v1937_v29  ;;  %v2011_v19 = vld [vmem:[#allocation5 + $0x268] ss:$16 sps:$4 sm:$0xff]   ;;  %v2016_v20 = vld [vmem:[#allocation5 + $0x284] ss:$16 sps:$4 sm:$0xff]   ;;  %v2019_v21 = vld [vmem:[#allocation5 + $0x28c] ss:$16 sps:$4 sm:$0xff]  }
  0x41   :  { %v2014_v22 = vld [vmem:[#allocation5 + $0x280] ss:$16 sps:$4 sm:$0xff]   ;;  %v2017_v23 = vld [vmem:[#allocation5 + $0x288] ss:$16 sps:$4 sm:$0xff]   ;;  %v2022_v24 = vld [vmem:[#allocation5 + $0x2a4] ss:$16 sps:$4 sm:$0xff]  }
  0x42   :  { %v2025_v25 = vld [vmem:[#allocation5 + $0x2ac] ss:$16 sps:$4 sm:$0xff]   ;;  %v2020_v26 = vld [vmem:[#allocation5 + $0x2a0] ss:$16 sps:$4 sm:$0xff]   ;;  %v2023_v27 = vld [vmem:[#allocation5 + $0x2a8] ss:$16 sps:$4 sm:$0xff]  }
  0x43   :  { %1285 = vmatpush1.bf16.msra.mxu0 %v1939_v30  ;;  %1449 = vmatpush1.bf16.msra.mxu1 %v1940_v31  ;;  %v2028_v28 = vld [vmem:[#allocation5 + $0x2c4] ss:$16 sps:$4 sm:$0xff]   ;;  %v2031_v29 = vld [vmem:[#allocation5 + $0x2cc] ss:$16 sps:$4 sm:$0xff]   ;;  %v2047_v46 = vld [vmem:[#allocation5 + $0x328] ss:$16 sps:$4 sm:$0xff]  }
  0x44   :  { %1286 = vmatprep.subr.bf16.mxu0 %v1941_v32  ;;  %1450 = vmatprep.subr.bf16.mxu1 %v1943_v33  ;;  %v2308_v30 = vld [vmem:[#allocation3 + $0x8] sm:$0xff]  ;;  %v2029_v33 = vld [vmem:[#allocation5 + $0x2c8] ss:$16 sps:$4 sm:$0xff]   ;;  %vm1636_vm5 = vcmask 1043456   ;;  %vm1654_vm6 = vcmask 3072  }
  0x45   :  { %v56_v31 = vcombine.high %v2308_v30, %v2308_v30  ;;  %v2026_v32 = vld [vmem:[#allocation5 + $0x2c0] ss:$16 sps:$4 sm:$0xff]   ;;  %v2055_v48 = vld [vmem:[#allocation5 + $0x34c] ss:$16 sps:$4 sm:$0xff]  }
  0x46   :  { %v2061_v52 = vld [vmem:[#allocation5 + $0x36c] ss:$16 sps:$4 sm:$0xff]  }
  0x47   :  { %1287 = vmatpush1.bf16.msra.mxu0 %v1945_v34  ;;  %1451 = vmatpush1.bf16.msra.mxu1 %v1946_v35  ;;  %v64_v34 = vpack.c.bf16 %v56_v31, %v56_v31  ;;  %v2034_v35 = vld [vmem:[#allocation5 + $0x2e4] ss:$16 sps:$4 sm:$0xff]  }
  0x48   :  { %1288 = vmatprep.subr.bf16.mxu0 %v1947_v36  ;;  %1452 = vmatprep.subr.bf16.mxu1 %v1949_v37  ;;  %v2037_v36 = vld [vmem:[#allocation5 + $0x2ec] ss:$16 sps:$4 sm:$0xff]   ;;  %v2032_v37 = vld [vmem:[#allocation5 + $0x2e0] ss:$16 sps:$4 sm:$0xff]   ;;  %v2119_v31 = vld [vmem:[#allocation5 + $0x4a4] ss:$16 sps:$4 sm:$0xff]  }
  0x4b   :  { %1289 = vmatpush1.bf16.msra.mxu0 %v1951_v38  ;;  %1453 = vmatpush1.bf16.msra.mxu1 %v1952_v39  ;;  %v2035_v38 = vld [vmem:[#allocation5 + $0x2e8] ss:$16 sps:$4 sm:$0xff]   ;;  %v2040_v39 = vld [vmem:[#allocation5 + $0x304] ss:$16 sps:$4 sm:$0xff]  }
  0x4c   :  { %1290 = vmatprep.subr.bf16.mxu0 %v1953_v40  ;;  %1454 = vmatprep.subr.bf16.mxu1 %v1955_v41  ;;  %v2043_v40 = vld [vmem:[#allocation5 + $0x30c] ss:$16 sps:$4 sm:$0xff]   ;;  %v2038_v41 = vld [vmem:[#allocation5 + $0x300] ss:$16 sps:$4 sm:$0xff]  }
  0x4f   :  { %1291 = vmatpush1.bf16.msra.mxu0 %v1957_v42  ;;  %1455 = vmatpush1.bf16.msra.mxu1 %v1958_v43  ;;  %v2041_v42 = vld [vmem:[#allocation5 + $0x308] ss:$16 sps:$4 sm:$0xff]   ;;  %v2046_v43 = vld [vmem:[#allocation5 + $0x324] ss:$16 sps:$4 sm:$0xff]  }
  0x50   :  { %1292 = vmatprep.subr.bf16.mxu0 %v1959_v44  ;;  %1456 = vmatprep.subr.bf16.mxu1 %v1961_v45  ;;  %v2049_v44 = vld [vmem:[#allocation5 + $0x32c] ss:$16 sps:$4 sm:$0xff]   ;;  %v2044_v45 = vld [vmem:[#allocation5 + $0x320] ss:$16 sps:$4 sm:$0xff]  }
  0x53   :  { %1293 = vmatpush1.bf16.msra.mxu0 %v1963_v47  ;;  %1457 = vmatpush1.bf16.msra.mxu1 %v1964_v49  ;;  %v2052_v47 = vld [vmem:[#allocation5 + $0x344] ss:$16 sps:$4 sm:$0xff]   ;;  %v2050_v49 = vld [vmem:[#allocation5 + $0x340] ss:$16 sps:$4 sm:$0xff]  }
  0x54   :  { %1294 = vmatprep.subr.bf16.mxu0 %v1965_v50  ;;  %1458 = vmatprep.subr.bf16.mxu1 %v1967_v51  ;;  %v2053_v50 = vld [vmem:[#allocation5 + $0x348] ss:$16 sps:$4 sm:$0xff]   ;;  %v2058_v51 = vld [vmem:[#allocation5 + $0x364] ss:$16 sps:$4 sm:$0xff]  }
  0x57   :  { %1295 = vmatpush1.bf16.msra.mxu0 %v1969_v53  ;;  %1459 = vmatpush1.bf16.msra.mxu1 %v1970_v54  ;;  %v2056_v53 = vld [vmem:[#allocation5 + $0x360] ss:$16 sps:$4 sm:$0xff]   ;;  %v2059_v54 = vld [vmem:[#allocation5 + $0x368] ss:$16 sps:$4 sm:$0xff]  }
  0x58   :  { %1296 = vmatprep.subr.bf16.mxu0 %v1971_v55  ;;  %1460 = vmatprep.subr.bf16.mxu1 %v1973_v56  ;;  %v2064_v55 = vld [vmem:[#allocation5 + $0x384] ss:$16 sps:$4 sm:$0xff]   ;;  %v2067_v56 = vld [vmem:[#allocation5 + $0x38c] ss:$16 sps:$4 sm:$0xff]  }
  0x5b   :  { %1297 = vmatpush1.bf16.msra.mxu0 %v1975_v57  ;;  %1461 = vmatpush1.bf16.msra.mxu1 %v1976_v58  ;;  %v2062_v57 = vld [vmem:[#allocation5 + $0x380] ss:$16 sps:$4 sm:$0xff]   ;;  %v2065_v58 = vld [vmem:[#allocation5 + $0x388] ss:$16 sps:$4 sm:$0xff]  }
  0x5c   :  { %1298 = vmatprep.subr.bf16.mxu0 %v1977_v59  ;;  %1462 = vmatprep.subr.bf16.mxu1 %v1979_v60  ;;  %v2070_v59 = vld [vmem:[#allocation5 + $0x3a4] ss:$16 sps:$4 sm:$0xff]   ;;  %v2073_v60 = vld [vmem:[#allocation5 + $0x3ac] ss:$16 sps:$4 sm:$0xff]  }
  0x5f   :  { %1299 = vmatpush1.bf16.msra.mxu0 %v1981_v61  ;;  %1463 = vmatpush1.bf16.msra.mxu1 %v1982_v62  ;;  %v2068_v61 = vld [vmem:[#allocation5 + $0x3a0] ss:$16 sps:$4 sm:$0xff]   ;;  %v2071_v62 = vld [vmem:[#allocation5 + $0x3a8] ss:$16 sps:$4 sm:$0xff]  }
  0x60   :  { %1300 = vmatprep.subr.bf16.mxu0 %v1983_v63  ;;  %1464 = vmatprep.subr.bf16.mxu1 %v1985_v0  ;;  %v2076_v63 = vld [vmem:[#allocation5 + $0x3c4] ss:$16 sps:$4 sm:$0xff]   ;;  %v2079_v0 = vld [vmem:[#allocation5 + $0x3cc] ss:$16 sps:$4 sm:$0xff]  }
  0x63   :  { %1301 = vmatpush1.bf16.msra.mxu0 %v1987_v1  ;;  %1465 = vmatpush1.bf16.msra.mxu1 %v1988_v2  ;;  %v2074_v1 = vld [vmem:[#allocation5 + $0x3c0] ss:$16 sps:$4 sm:$0xff]   ;;  %v2077_v2 = vld [vmem:[#allocation5 + $0x3c8] ss:$16 sps:$4 sm:$0xff]  }
  0x64   :  { %1311 = vmatprep.subr.bf16.mxu0 %v1992_v3  ;;  %1475 = vmatprep.subr.bf16.mxu1 %v1995_v4  ;;  %v2082_v3 = vld [vmem:[#allocation5 + $0x3e4] ss:$16 sps:$4 sm:$0xff]   ;;  %v2085_v4 = vld [vmem:[#allocation5 + $0x3ec] ss:$16 sps:$4 sm:$0xff]  }
  0x66   :  { %1303 = vmatmul.mubr.bf16.vlgmr.msra.gmra.mrb[0].mxu0 %v61_v6  ;;  %1467 = vmatmul.mubr.bf16.vlgmr.msra.gmra.mrb[0].mxu1 %v61_v6  ;;  %v2083_v6 = vld [vmem:[#allocation5 + $0x3e8] ss:$16 sps:$4 sm:$0xff]  }
  0x67   :  { %1312 = vmatpush1.bf16.msra.mxu0 %v1990_v5  ;;  %1476 = vmatpush1.bf16.msra.mxu1 %v1993_v7  ;;  %v2080_v5 = vld [vmem:[#allocation5 + $0x3e0] ss:$16 sps:$4 sm:$0xff]   ;;  %v2089_v7 = vld [vmem:[#allocation5 + $0x404] ss:$16 sps:$4 sm:$0xff]  }
  0x68   :  { %1313 = vmatprep.subr.bf16.mxu0 %v1998_v8  ;;  %1477 = vmatprep.subr.bf16.mxu1 %v2001_v9  ;;  %v2092_v8 = vld [vmem:[#allocation5 + $0x40c] ss:$16 sps:$4 sm:$0xff]   ;;  %v63_v9 = vpack.c.bf16 %v2308_v30, %v2308_v30  ;;  %v2114_v30 = vld [vmem:[#allocation5 + $0x488] ss:$16 sps:$4 sm:$0xff]  }
  0x69   :  { %1343 = vmatprep.mubr.bf16.mxu0 %v64_v34  ;;  %1507 = vmatprep.mubr.bf16.mxu1 %v64_v34  ;;  %v2120_v34 = vld [vmem:[#allocation5 + $0x4a8] ss:$16 sps:$4 sm:$0xff]  }
  0x6b   :  { %1314 = vmatpush1.bf16.msra.mxu0 %v1996_v10  ;;  %1478 = vmatpush1.bf16.msra.mxu1 %v1999_v11  ;;  %v2087_v10 = vld [vmem:[#allocation5 + $0x400] ss:$16 sps:$4 sm:$0xff]   ;;  %v2090_v11 = vld [vmem:[#allocation5 + $0x408] ss:$16 sps:$4 sm:$0xff]  }
  0x6c   :  { %1315 = vmatprep.subr.bf16.mxu0 %v2004_v12  ;;  %1479 = vmatprep.subr.bf16.mxu1 %v2007_v13  ;;  %v2095_v12 = vld [vmem:[#allocation5 + $0x424] ss:$16 sps:$4 sm:$0xff]  }
  0x6d   :  { %v2314_v13 = vld [vmem:[#allocation3 + $0x10] sm:$0xff] }
  0x6f   :  { %1316 = vmatpush1.bf16.msra.mxu0 %v2002_v14  ;;  %1480 = vmatpush1.bf16.msra.mxu1 %v2005_v15  ;;  %v2098_v14 = vld [vmem:[#allocation5 + $0x42c] ss:$16 sps:$4 sm:$0xff]   ;;  %v57_v15 = vcombine.high %v2314_v13, %v2314_v13 }
  0x70   :  { %1317 = vmatprep.subr.bf16.mxu0 %v2010_v16  ;;  %1481 = vmatprep.subr.bf16.mxu1 %v2013_v17  ;;  %v2093_v17 = vld [vmem:[#allocation5 + $0x420] ss:$16 sps:$4 sm:$0xff]  }
  0x71   :  { %v66_v16 = vpack.c.bf16 %v57_v15, %v57_v15  ;;  %v2184_v15 = vld [vmem:[#allocation5 + $0x600] ss:$16 sps:$4 sm:$0xff]  }
  0x73   :  { %1318 = vmatpush1.bf16.msra.mxu0 %v2008_v18  ;;  %1482 = vmatpush1.bf16.msra.mxu1 %v2011_v19  ;;  %v2096_v18 = vld [vmem:[#allocation5 + $0x428] ss:$16 sps:$4 sm:$0xff]   ;;  %v2101_v19 = vld [vmem:[#allocation5 + $0x444] ss:$16 sps:$4 sm:$0xff]  }
  0x74   :  { %1319 = vmatprep.subr.bf16.mxu0 %v2016_v20  ;;  %1483 = vmatprep.subr.bf16.mxu1 %v2019_v21  ;;  %v2104_v20 = vld [vmem:[#allocation5 + $0x44c] ss:$16 sps:$4 sm:$0xff]   ;;  %v2099_v21 = vld [vmem:[#allocation5 + $0x440] ss:$16 sps:$4 sm:$0xff]  }
  0x77   :  { %1320 = vmatpush1.bf16.msra.mxu0 %v2014_v22  ;;  %1484 = vmatpush1.bf16.msra.mxu1 %v2017_v23  ;;  %v2102_v22 = vld [vmem:[#allocation5 + $0x448] ss:$16 sps:$4 sm:$0xff]   ;;  %v2107_v23 = vld [vmem:[#allocation5 + $0x464] ss:$16 sps:$4 sm:$0xff]  }
  0x78   :  { %1321 = vmatprep.subr.bf16.mxu0 %v2022_v24  ;;  %1485 = vmatprep.subr.bf16.mxu1 %v2025_v25  ;;  %v2110_v24 = vld [vmem:[#allocation5 + $0x46c] ss:$16 sps:$4 sm:$0xff]   ;;  %v2105_v25 = vld [vmem:[#allocation5 + $0x460] ss:$16 sps:$4 sm:$0xff]  }
  0x7b   :  { %1322 = vmatpush1.bf16.msra.mxu0 %v2020_v26  ;;  %1486 = vmatpush1.bf16.msra.mxu1 %v2023_v27  ;;  %v2108_v26 = vld [vmem:[#allocation5 + $0x468] ss:$16 sps:$4 sm:$0xff]   ;;  %v2113_v27 = vld [vmem:[#allocation5 + $0x484] ss:$16 sps:$4 sm:$0xff]  }
  0x7c   :  { %1323 = vmatprep.subr.bf16.mxu0 %v2028_v28  ;;  %1487 = vmatprep.subr.bf16.mxu1 %v2031_v29  ;;  %v2116_v28 = vld [vmem:[#allocation5 + $0x48c] ss:$16 sps:$4 sm:$0xff]   ;;  %v2111_v29 = vld [vmem:[#allocation5 + $0x480] ss:$16 sps:$4 sm:$0xff]  }
  0x7f   :  { %1324 = vmatpush1.bf16.msra.mxu0 %v2026_v32  ;;  %1488 = vmatpush1.bf16.msra.mxu1 %v2029_v33  ;;  %v2122_v32 = vld [vmem:[#allocation5 + $0x4ac] ss:$16 sps:$4 sm:$0xff]   ;;  %v2117_v33 = vld [vmem:[#allocation5 + $0x4a0] ss:$16 sps:$4 sm:$0xff]  }
  0x80   :  { %1325 = vmatprep.subr.bf16.mxu0 %v2034_v35  ;;  %1489 = vmatprep.subr.bf16.mxu1 %v2037_v36  ;;  %v2125_v35 = vld [vmem:[#allocation5 + $0x4c4] ss:$16 sps:$4 sm:$0xff]   ;;  %v2128_v36 = vld [vmem:[#allocation5 + $0x4cc] ss:$16 sps:$4 sm:$0xff]  }
  0x83   :  { %1326 = vmatpush1.bf16.msra.mxu0 %v2032_v37  ;;  %1490 = vmatpush1.bf16.msra.mxu1 %v2035_v38  ;;  %v2123_v37 = vld [vmem:[#allocation5 + $0x4c0] ss:$16 sps:$4 sm:$0xff]   ;;  %v2126_v38 = vld [vmem:[#allocation5 + $0x4c8] ss:$16 sps:$4 sm:$0xff]  }
  0x84   :  { %1327 = vmatprep.subr.bf16.mxu0 %v2040_v39  ;;  %1491 = vmatprep.subr.bf16.mxu1 %v2043_v40  ;;  %v2131_v39 = vld [vmem:[#allocation5 + $0x4e4] ss:$16 sps:$4 sm:$0xff]   ;;  %v2134_v40 = vld [vmem:[#allocation5 + $0x4ec] ss:$16 sps:$4 sm:$0xff]  }
  0x87   :  { %1328 = vmatpush1.bf16.msra.mxu0 %v2038_v41  ;;  %1492 = vmatpush1.bf16.msra.mxu1 %v2041_v42  ;;  %v2129_v41 = vld [vmem:[#allocation5 + $0x4e0] ss:$16 sps:$4 sm:$0xff]   ;;  %v2132_v42 = vld [vmem:[#allocation5 + $0x4e8] ss:$16 sps:$4 sm:$0xff]  }
  0x88   :  { %1329 = vmatprep.subr.bf16.mxu0 %v2046_v43  ;;  %1493 = vmatprep.subr.bf16.mxu1 %v2049_v44  ;;  %v2137_v43 = vld [vmem:[#allocation5 + $0x504] ss:$16 sps:$4 sm:$0xff]   ;;  %v2140_v44 = vld [vmem:[#allocation5 + $0x50c] ss:$16 sps:$4 sm:$0xff]  }
  0x8b   :  { %1330 = vmatpush1.bf16.msra.mxu0 %v2044_v45  ;;  %1494 = vmatpush1.bf16.msra.mxu1 %v2047_v46  ;;  %v2135_v45 = vld [vmem:[#allocation5 + $0x500] ss:$16 sps:$4 sm:$0xff]   ;;  %v2138_v46 = vld [vmem:[#allocation5 + $0x508] ss:$16 sps:$4 sm:$0xff]  }
  0x8c   :  { %1331 = vmatprep.subr.bf16.mxu0 %v2052_v47  ;;  %1495 = vmatprep.subr.bf16.mxu1 %v2055_v48  ;;  %v2143_v47 = vld [vmem:[#allocation5 + $0x524] ss:$16 sps:$4 sm:$0xff]   ;;  %v2146_v48 = vld [vmem:[#allocation5 + $0x52c] ss:$16 sps:$4 sm:$0xff]  }
  0x8f   :  { %1332 = vmatpush1.bf16.msra.mxu0 %v2050_v49  ;;  %1496 = vmatpush1.bf16.msra.mxu1 %v2053_v50  ;;  %v2141_v49 = vld [vmem:[#allocation5 + $0x520] ss:$16 sps:$4 sm:$0xff]   ;;  %v2144_v50 = vld [vmem:[#allocation5 + $0x528] ss:$16 sps:$4 sm:$0xff]  }
  0x90   :  { %1333 = vmatprep.subr.bf16.mxu0 %v2058_v51  ;;  %1497 = vmatprep.subr.bf16.mxu1 %v2061_v52  ;;  %v2149_v51 = vld [vmem:[#allocation5 + $0x544] ss:$16 sps:$4 sm:$0xff]   ;;  %v2152_v52 = vld [vmem:[#allocation5 + $0x54c] ss:$16 sps:$4 sm:$0xff]  }
  0x93   :  { %1334 = vmatpush1.bf16.msra.mxu0 %v2056_v53  ;;  %1498 = vmatpush1.bf16.msra.mxu1 %v2059_v54  ;;  %v2147_v53 = vld [vmem:[#allocation5 + $0x540] ss:$16 sps:$4 sm:$0xff]   ;;  %v2150_v54 = vld [vmem:[#allocation5 + $0x548] ss:$16 sps:$4 sm:$0xff]  }
  0x94   :  { %1335 = vmatprep.subr.bf16.mxu0 %v2064_v55  ;;  %1499 = vmatprep.subr.bf16.mxu1 %v2067_v56  ;;  %v2155_v55 = vld [vmem:[#allocation5 + $0x564] ss:$16 sps:$4 sm:$0xff]   ;;  %v2158_v56 = vld [vmem:[#allocation5 + $0x56c] ss:$16 sps:$4 sm:$0xff]  }
  0x97   :  { %1336 = vmatpush1.bf16.msra.mxu0 %v2062_v57  ;;  %1500 = vmatpush1.bf16.msra.mxu1 %v2065_v58  ;;  %v2153_v57 = vld [vmem:[#allocation5 + $0x560] ss:$16 sps:$4 sm:$0xff]   ;;  %v2156_v58 = vld [vmem:[#allocation5 + $0x568] ss:$16 sps:$4 sm:$0xff]  }
  0x98   :  { %1337 = vmatprep.subr.bf16.mxu0 %v2070_v59  ;;  %1501 = vmatprep.subr.bf16.mxu1 %v2073_v60  ;;  %v2161_v59 = vld [vmem:[#allocation5 + $0x584] ss:$16 sps:$4 sm:$0xff]   ;;  %v2164_v60 = vld [vmem:[#allocation5 + $0x58c] ss:$16 sps:$4 sm:$0xff]  }
  0x9b   :  { %1338 = vmatpush1.bf16.msra.mxu0 %v2068_v61  ;;  %1502 = vmatpush1.bf16.msra.mxu1 %v2071_v62  ;;  %v2159_v61 = vld [vmem:[#allocation5 + $0x580] ss:$16 sps:$4 sm:$0xff]   ;;  %v2162_v62 = vld [vmem:[#allocation5 + $0x588] ss:$16 sps:$4 sm:$0xff]  }
  0x9c   :  { %1339 = vmatprep.subr.bf16.mxu0 %v2076_v63  ;;  %1503 = vmatprep.subr.bf16.mxu1 %v2079_v0  ;;  %v2167_v63 = vld [vmem:[#allocation5 + $0x5a4] ss:$16 sps:$4 sm:$0xff]   ;;  %v2170_v0 = vld [vmem:[#allocation5 + $0x5ac] ss:$16 sps:$4 sm:$0xff]  }
  0x9f   :  { %1340 = vmatpush1.bf16.msra.mxu0 %v2074_v1  ;;  %1504 = vmatpush1.bf16.msra.mxu1 %v2077_v2  ;;  %v2165_v1 = vld [vmem:[#allocation5 + $0x5a0] ss:$16 sps:$4 sm:$0xff]   ;;  %v2168_v2 = vld [vmem:[#allocation5 + $0x5a8] ss:$16 sps:$4 sm:$0xff]  }
  0xa0   :  { %1341 = vmatprep.subr.bf16.mxu0 %v2082_v3  ;;  %1505 = vmatprep.subr.bf16.mxu1 %v2085_v4  ;;  %v2173_v3 = vld [vmem:[#allocation5 + $0x5c4] ss:$16 sps:$4 sm:$0xff]   ;;  %v2176_v4 = vld [vmem:[#allocation5 + $0x5cc] ss:$16 sps:$4 sm:$0xff]  }
  0xa3   :  { %1342 = vmatpush1.bf16.msra.mxu0 %v2080_v5  ;;  %1506 = vmatpush1.bf16.msra.mxu1 %v2083_v6  ;;  %v2171_v5 = vld [vmem:[#allocation5 + $0x5c0] ss:$16 sps:$4 sm:$0xff]   ;;  %v2174_v6 = vld [vmem:[#allocation5 + $0x5c8] ss:$16 sps:$4 sm:$0xff]  }
  0xa4   :  { %1352 = vmatprep.subr.bf16.mxu0 %v2089_v7  ;;  %1516 = vmatprep.subr.bf16.mxu1 %v2092_v8  ;;  %v2179_v7 = vld [vmem:[#allocation5 + $0x5e4] ss:$16 sps:$4 sm:$0xff]   ;;  %v2182_v8 = vld [vmem:[#allocation5 + $0x5ec] ss:$16 sps:$4 sm:$0xff]  }
  0xa6   :  { %1344 = vmatmul.mubr.bf16.vlgmr.msra.gmra.mrb[0].mxu0 %v63_v9  ;;  %1508 = vmatmul.mubr.bf16.vlgmr.msra.gmra.mrb[0].mxu1 %v63_v9  ;;  %v2177_v9 = vld [vmem:[#allocation5 + $0x5e0] ss:$16 sps:$4 sm:$0xff]  }
  0xa7   :  { %1353 = vmatpush1.bf16.msra.mxu0 %v2087_v10  ;;  %1517 = vmatpush1.bf16.msra.mxu1 %v2090_v11  ;;  %v2180_v10 = vld [vmem:[#allocation5 + $0x5e8] ss:$16 sps:$4 sm:$0xff]   ;;  %v2186_v11 = vld [vmem:[#allocation5 + $0x604] ss:$16 sps:$4 sm:$0xff]  }
  0xa8   :  { %1354 = vmatprep.subr.bf16.mxu0 %v2095_v12  ;;  %1518 = vmatprep.subr.bf16.mxu1 %v2098_v14  ;;  %v2189_v12 = vld [vmem:[#allocation5 + $0x60c] ss:$16 sps:$4 sm:$0xff]   ;;  %v65_v14 = vpack.c.bf16 %v2314_v13, %v2314_v13 }
  0xa9   :  { %1384 = vmatprep.mubr.bf16.mxu0 %v66_v16  ;;  %1548 = vmatprep.mubr.bf16.mxu1 %v66_v16  ;;  %v2187_v16 = vld [vmem:[#allocation5 + $0x608] ss:$16 sps:$4 sm:$0xff]  }
  0xab   :  { %1355 = vmatpush1.bf16.msra.mxu0 %v2093_v17  ;;  %1519 = vmatpush1.bf16.msra.mxu1 %v2096_v18  ;;  %v2246_v17 = vmov 0   ;;  %v51_v18 = vld [vmem:[#allocation3 + $0x18] sm:$0xf] }
  0xac   :  { %1356 = vmatprep.subr.bf16.mxu0 %v2101_v19  ;;  %1520 = vmatprep.subr.bf16.mxu1 %v2104_v20  ;;  %v67_v19 = vpack.c.bf16 %v51_v18, %v51_v18  ;;  %v266_v20 = vlaneseq }
  0xae   :  { %v267_v13 = vshrl.u32 %v266_v20, 7 }
  0xaf   :  { %1357 = vmatpush1.bf16.msra.mxu0 %v2099_v21  ;;  %1521 = vmatpush1.bf16.msra.mxu1 %v2102_v22 }
  0xb0   :  { %1358 = vmatprep.subr.bf16.mxu0 %v2107_v23  ;;  %1522 = vmatprep.subr.bf16.mxu1 %v2110_v24  ;;  %v268_v21 = vsub.s32 0, %v267_v13  ;;  %v276_v22 = vsub.s32 2, %v267_v13  ;;  %v264_v23 = vld [vmem:[%s2334_s2] sm:$0xf]  ;;  %v272_v24 = vsub.s32 1, %v267_v13 }
  0xb3   :  { %1359 = vmatpush1.bf16.msra.mxu0 %v2105_v25  ;;  %1523 = vmatpush1.bf16.msra.mxu1 %v2108_v26  ;;  %v280_v25 = vsub.s32 3, %v267_v13  ;;  %v269_v26 = vrot.slane %v264_v23, %v268_v21 }
  0xb4   :  { %1360 = vmatprep.subr.bf16.mxu0 %v2113_v27  ;;  %1524 = vmatprep.subr.bf16.mxu1 %v2116_v28  ;;  %v277_v27 = vrot.slane %v264_v23, %v276_v22  ;;  %v1610_v28 = vld [vmem:[%s2335_s3] sm:$0xf] }
  0xb7   :  { %1361 = vmatpush1.bf16.msra.mxu0 %v2111_v29  ;;  %1525 = vmatpush1.bf16.msra.mxu1 %v2114_v30  ;;  %v273_v29 = vrot.slane %v264_v23, %v272_v24  ;;  %v281_v30 = vrot.slane %v264_v23, %v280_v25 }
  0xb8   :  { %1362 = vmatprep.subr.bf16.mxu0 %v2119_v31  ;;  %1526 = vmatprep.subr.bf16.mxu1 %v2122_v32 }
  0xbb   :  { %1363 = vmatpush1.bf16.msra.mxu0 %v2117_v33  ;;  %1527 = vmatpush1.bf16.msra.mxu1 %v2120_v34  ;;  %v1615_v34 = vrot.slane %v1610_v28, %v268_v21 }
  0xbc   :  { %1364 = vmatprep.subr.bf16.mxu0 %v2125_v35  ;;  %1528 = vmatprep.subr.bf16.mxu1 %v2128_v36 }
  0xbf   :  { %1365 = vmatpush1.bf16.msra.mxu0 %v2123_v37  ;;  %1529 = vmatpush1.bf16.msra.mxu1 %v2126_v38  ;;  %v1623_v38 = vrot.slane %v1610_v28, %v276_v22 }
  0xc0   :  { %1366 = vmatprep.subr.bf16.mxu0 %v2131_v39  ;;  %1530 = vmatprep.subr.bf16.mxu1 %v2134_v40  ;;  %v1619_v40 = vrot.slane %v1610_v28, %v272_v24 }
  0xc3   :  { %1367 = vmatpush1.bf16.msra.mxu0 %v2129_v41  ;;  %1531 = vmatpush1.bf16.msra.mxu1 %v2132_v42 }
  0xc4   :  { %1368 = vmatprep.subr.bf16.mxu0 %v2137_v43  ;;  %1532 = vmatprep.subr.bf16.mxu1 %v2140_v44 }
  0xc7   :  { %1369 = vmatpush1.bf16.msra.mxu0 %v2135_v45  ;;  %1533 = vmatpush1.bf16.msra.mxu1 %v2138_v46 }
  0xc8   :  { %1370 = vmatprep.subr.bf16.mxu0 %v2143_v47  ;;  %1534 = vmatprep.subr.bf16.mxu1 %v2146_v48 }
  0xcb   :  { %1371 = vmatpush1.bf16.msra.mxu0 %v2141_v49  ;;  %1535 = vmatpush1.bf16.msra.mxu1 %v2144_v50 }
  0xcc   :  { %1372 = vmatprep.subr.bf16.mxu0 %v2149_v51  ;;  %1536 = vmatprep.subr.bf16.mxu1 %v2152_v52  ;;  %v1627_v52 = vrot.slane %v1610_v28, %v280_v25 }
  0xcf   :  { %1373 = vmatpush1.bf16.msra.mxu0 %v2147_v53  ;;  %1537 = vmatpush1.bf16.msra.mxu1 %v2150_v54 }
  0xd0   :  { %1374 = vmatprep.subr.bf16.mxu0 %v2155_v55  ;;  %1538 = vmatprep.subr.bf16.mxu1 %v2158_v56 }
  0xd3   :  { %1375 = vmatpush1.bf16.msra.mxu0 %v2153_v57  ;;  %1539 = vmatpush1.bf16.msra.mxu1 %v2156_v58 }
  0xd4   :  { %1376 = vmatprep.subr.bf16.mxu0 %v2161_v59  ;;  %1540 = vmatprep.subr.bf16.mxu1 %v2164_v60 }
  0xd7   :  { %1377 = vmatpush1.bf16.msra.mxu0 %v2159_v61  ;;  %1541 = vmatpush1.bf16.msra.mxu1 %v2162_v62 }
  0xd8   :  { %1378 = vmatprep.subr.bf16.mxu0 %v2167_v63  ;;  %1542 = vmatprep.subr.bf16.mxu1 %v2170_v0 }
  0xdb   :  { %1379 = vmatpush1.bf16.msra.mxu0 %v2165_v1  ;;  %1543 = vmatpush1.bf16.msra.mxu1 %v2168_v2  ;;  %v1647_v2 = vstv %s2336_s4 }
  0xdc   :  { %1380 = vmatprep.subr.bf16.mxu0 %v2173_v3  ;;  %1544 = vmatprep.subr.bf16.mxu1 %v2176_v4 }
  0xdf   :  { %1381 = vmatpush1.bf16.msra.mxu0 %v2171_v5  ;;  %1545 = vmatpush1.bf16.msra.mxu1 %v2174_v6 }
  0xe0   :  { %1382 = vmatprep.subr.bf16.mxu0 %v2179_v7  ;;  %1546 = vmatprep.subr.bf16.mxu1 %v2182_v8 }
  0xe3   :  { %1383 = vmatpush1.bf16.msra.mxu0 %v2177_v9  ;;  %1547 = vmatpush1.bf16.msra.mxu1 %v2180_v10 }
  0xe4   :  { %1393 = vmatprep.subr.bf16.mxu0 %v2186_v11  ;;  %1557 = vmatprep.subr.bf16.mxu1 %v2189_v12 }
  0xe6   :  { %1385 = vmatmul.mubr.bf16.vlgmr.msra.gmra.mrb[0].mxu0 %v65_v14  ;;  %1549 = vmatmul.mubr.bf16.vlgmr.msra.gmra.mrb[0].mxu1 %v65_v14 }
  0xe7   :  { %1394 = vmatpush1.bf16.msra.mxu0 %v2184_v15  ;;  %1558 = vmatpush1.bf16.msra.mxu1 %v2187_v16 }
  0xe8   :  { %1425 = vmatprep.mubr.bf16.mxu0 %v2246_v17  ;;  %1589 = vmatprep.mubr.bf16.mxu1 %v2246_v17 }
  0xf2   :  { %1858 = vmatmul.mubr.msk.bf16.vlgmr.msra.gmra.mrb[0].mxu0 %vm1266_vm0, %v67_v19  ;;  %1859 = vmatmul.mubr.msk.bf16.vlgmr.msra.gmra.mrb[0].mxu1 %vm1266_vm0, %v67_v19 }
 0x1c5   :  { %v1427_v31 = vpop.f32.mrb[0].mxu0  ;;  %v1591_v32 = vpop.f32.mrb[0].mxu1 }
 0x1c6   :  { %v1860_v33 = vadd.f32 %v1427_v31, %v269_v26  ;;  %v1862_v35 = vadd.f32 %v1591_v32, %v277_v27  ;;  %v1429_v36 = vpop.f32.mrb[1].mxu0  ;;  %v1593_v37 = vpop.f32.mrb[1].mxu1 }
 0x1c7   :  { %v1861_v39 = vadd.f32 %v1429_v36, %v273_v29  ;;  %v1863_v41 = vadd.f32 %v1593_v37, %v281_v30  ;;  %v1431_v42 = vpop.f32.mrb[2].mxu0  ;;  %v1595_v43 = vpop.f32.mrb[2].mxu1 }
 0x1c8   :  { %vm1598_vm1 = vcmp.gt.f32.partialorder %v1860_v33, 0.0  ;;  %v1602_v44 = vmul.f32 0.1, %v1860_v33  ;;  %vm1600_vm2 = vcmp.gt.f32.partialorder %v1862_v35, 0.0  ;;  %v1604_v45 = vmul.f32 0.1, %v1862_v35 }
 0x1c9   :  { %vm1599_vm3 = vcmp.gt.f32.partialorder %v1861_v39, 0.0  ;;  %v1603_v46 = vmul.f32 0.1, %v1861_v39  ;;  %vm1601_vm4 = vcmp.gt.f32.partialorder %v1863_v41, 0.0  ;;  %v1605_v47 = vmul.f32 0.1, %v1863_v41 }
 0x1ca   :  { %v1606_v48 = vsel %vm1598_vm1, %v1860_v33, %v1602_v44  ;;  %v1608_v49 = vsel %vm1600_vm2, %v1862_v35, %v1604_v45  ;;  %v1432_v50 = vpop.f32.mrb[3].mxu0  ;;  %v1596_v51 = vpop.f32.mrb[3].mxu1 }
 0x1cb   :  { %v1632_v53 = vmul.f32 %v1615_v34, %v1606_v48  ;;  %v1607_v54 = vsel %vm1599_vm3, %v1861_v39, %v1603_v46  ;;  %v1609_v55 = vsel %vm1601_vm4, %v1863_v41, %v1605_v47  ;;  %v1634_v57 = vmul.f32 %v1623_v38, %v1608_v49 }
 0x1cc   :  { %v1633_v56 = vmul.f32 %v1619_v40, %v1607_v54  ;;  %v1635_v59 = vmul.f32 %v1627_v52, %v1609_v55 }
 0x1cd   :  { %v1637_v58 = vsel %vm1636_vm5, %v1632_v53, 0.0  ;;  %v1640_v62 = vsel %vm1636_vm5, %v1634_v57, 0.0 }
 0x1ce   :  { %v1638_v60 = vsel %vm1636_vm5, %v1633_v56, 0.0  ;;  %v1642_v0 = vsel %vm1636_vm5, %v1635_v59, 0.0 }
 0x1cf   :  { %v1639_v61 = vadd.f32 %v1638_v60, %v1637_v58 }
 0x1d1   :  { %v1641_v63 = vadd.f32 %v1640_v62, %v1639_v61 }
 0x1d3   :  { %v1643_v1 = vadd.f32 %v1642_v0, %v1641_v63 }
 0x1d5   :  { %1644 = vadd.xlane.f32.xlu0 %v1643_v1 }
 0x262   :  { %v1645_v3 = vpop.xlane.xlu0 %1644 }
 0x263   :  { %v1648_v4 = vadd.f32 %v1647_v2, %v1645_v3 }
 0x265   :  { %v1649_v5 = vsub.f32 0.0, %v1648_v4 }
 0x267   :  { %v1650_v6 = vmul.f32 1.442695, %v1649_v5 }
 0x269   :  { %2190 = vpow2.f32 %v1650_v6 }
 0x273   :  { %v2191_v7 = vpop.eup %2190 }
 0x274   :  { %v1652_v8 = vadd.f32 1.0, %v2191_v7 }
 0x276   :  { %2192 = vrcp.f32 %v1652_v8 }
 0x280   :  { %v2193_v9 = vpop.eup %2192 }
 0x281   :  { %1655 = vst.msk [vmem:[%s2337_s5] sm:$0xf] %vm1654_vm6, %v2193_v9 }
 0x282   :  { %1660 = vsyncpa [#allocation4], 1 }
 0x283   :  { %1661 = vsyncpa [#allocation6], 1 }

</bundles_post_ra>
